<compile_context>
chip_gen: v7x
topology: tpu7x:2x2x1
jax: 0.10.0
libtpu: 0.0.40
codegen_flags: <defaults>
</compile_context>

<pallas_src>
import jax
import jax.numpy as jnp
from jax.experimental import pallas as pl
from jax.experimental.pallas import tpu as pltpu


# ----------------------------------------------------------------------------
# helpers
# ----------------------------------------------------------------------------
def _round_up(x, m):
    return ((x + m - 1) // m) * m


def _sublane_pack(dtype):
    # rows packed per 32-bit sublane: f32 -> 8, bf16 -> 16, int8/fp8 -> 32
    return 8 * max(1, 4 // jnp.dtype(dtype).itemsize)


def _pad2(a, rows, cols):
    r, c = a.shape
    if r == rows and c == cols:
        return a                      # zero-copy pass-through when aligned
    return jnp.pad(a, ((0, rows - r), (0, cols - c)))


def _vmem_budget_bytes():
    """Generation-aware VMEM budget (v5e/v6e: 128 MiB physical, v7x: 64 MiB)."""
    cap = None
    try:
        cap = getattr(pltpu.get_tpu_info(), "vmem_capacity_bytes", None)
    except Exception:
        cap = None
    if not cap:
        cap = 64 * 1024 * 1024        # conservative floor (v7x per-TC VMEM)
    # Leave headroom for compiler-internal scratch / semaphores.
    return min(int(cap * 0.75), 112 * 1024 * 1024)


def _compiler_params(dimension_semantics):
    return pltpu.CompilerParams(
        dimension_semantics=dimension_semantics,
        vmem_limit_bytes=_vmem_budget_bytes(),
    )


def _resident_spec(block_shape, index_map, single_buffer):
    """Spec for an operand whose index_map is constant (fully resident).
    With single_buffer=True request buffer_count=1 so full weights are not
    double-buffered in VMEM (matters on v7x's 64 MiB); fall back silently if
    this jax version does not accept pipeline_mode."""
    if single_buffer:
        try:
            return pl.BlockSpec(block_shape, index_map,
                                pipeline_mode=pl.Buffered(1))
        except Exception:
            pass
    return pl.BlockSpec(block_shape, index_map)


# ----------------------------------------------------------------------------
# single fused Linear + ReLU, tiled over (M, N, K)
# ----------------------------------------------------------------------------
def _linear_relu_kernel(x_ref, w_ref, b_ref, o_ref, acc_ref):
    k = pl.program_id(2)
    # Hot loop: pure MXU work, f32 accumulation.
    prod = jnp.dot(x_ref[...], w_ref[...], preferred_element_type=jnp.float32)

    @pl.when(k == 0)
    def _():
        acc_ref[...] = prod            # direct overwrite: no zero-init VPU pass

    @pl.when(k > 0)
    def _():
        acc_ref[...] += prod

    # Bias + ReLU only once, on the last K step (accumulator resident over K).
    @pl.when(k == pl.num_programs(2) - 1)
    def _():
        o_ref[...] = jnp.maximum(
            acc_ref[...] + b_ref[...], 0.0
        ).astype(o_ref.dtype)


def linear_relu(x, w, b, *, tm=512, tn=512, tk=512,
                compute_dtype=jnp.bfloat16):
    """relu(x @ w + b) via a tiled Pallas kernel.

    x: (M, K), w: (K, N), b: (N,). Matmul operands are cast to compute_dtype
    (bf16 by default, f32 accumulation), bias/epilogue/output stay f32.
    """
    M, K = x.shape
    K2, N = w.shape
    assert K == K2, "shape mismatch"
    out_dtype = x.dtype
    cdt = jnp.dtype(compute_dtype if compute_dtype is not None else x.dtype)
    sub_m = _sublane_pack(cdt)

    Mp0 = _round_up(M, sub_m)
    Np0 = _round_up(N, 128)
    Kp0 = _round_up(K, 128)

    # Maximize tm first: W is re-read Mp/tm times, X is re-read Np/tn times;
    # for weight-dominated MLP shapes a full-M tile streams W exactly once.
    tm = min(_round_up(tm, sub_m), Mp0)
    tn = min(_round_up(tn, 128), Np0)
    tk = min(_round_up(tk, 128), Kp0)

    # v7x megacore: ensure at least one "parallel" axis has >= 2 tiles.
    if Mp0 <= tm and Np0 <= tn:
        if Np0 >= 256 and Np0 % 256 == 0:
            tn = Np0 // 2
        elif Mp0 >= 2 * sub_m and Mp0 % (2 * sub_m) == 0:
            tm = Mp0 // 2

    Mp, Np, Kp = _round_up(M, tm), _round_up(N, tn), _round_up(K, tk)

    # Cast before padding (padding bf16 moves half the bytes); both are no-ops
    # when the dtype/shape is already right.
    # TODO(synk): handle a ragged M edge with a masked epilogue instead of
    # padding the activation when M is large and badly aligned.
    xp = _pad2(x.astype(cdt), Mp, Kp)
    wp = _pad2(w.astype(cdt), Kp, Np)
    bp = _pad2(b.reshape(1, N).astype(jnp.float32), 1, Np)

    grid = (Mp // tm, Np // tn, Kp // tk)
    out = pl.pallas_call(
        _linear_relu_kernel,
        out_shape=jax.ShapeDtypeStruct((Mp, Np), out_dtype),
        grid_spec=pltpu.PrefetchScalarGridSpec(
            num_scalar_prefetch=0,
            grid=grid,
            in_specs=[
                pl.BlockSpec((tm, tk), lambda i, j, k: (i, k)),
                pl.BlockSpec((tk, tn), lambda i, j, k: (k, j)),
                pl.BlockSpec((1, tn), lambda i, j, k: (0, j)),
            ],
            out_specs=pl.BlockSpec((tm, tn), lambda i, j, k: (i, j)),
            scratch_shapes=[pltpu.VMEM((tm, tn), jnp.float32)],
        ),
        compiler_params=_compiler_params(("parallel", "parallel", "arbitrary")),
    )(xp, wp, bp)
    if (Mp, Np) != (M, N):
        out = out[:M, :N]
    return out


# ----------------------------------------------------------------------------
# fused 2-layer MLP: o = relu(relu(x@W1+b1) @ W2 + b2) in ONE pallas_call
# (hidden activation lives in a VMEM scratch, never touches HBM)
# ----------------------------------------------------------------------------
def _mlp2_kernel(x_ref, w1_ref, b1_ref, w2_ref, b2_ref, o_ref, h_ref):
    h = jnp.dot(x_ref[...], w1_ref[...], preferred_element_type=jnp.float32)
    h = jnp.maximum(h + b1_ref[...], 0.0)
    h_ref[...] = h.astype(h_ref.dtype)            # hidden kept in VMEM scratch
    o = jnp.dot(h_ref[...], w2_ref[...], preferred_element_type=jnp.float32)
    o_ref[...] = jnp.maximum(o + b2_ref[...], 0.0).astype(o_ref.dtype)


def mlp2_fused(x, w1, b1, w2, b2, *, tm=512, compute_dtype=jnp.bfloat16,
               single_buffer_weights=True):
    M, K = x.shape
    H = w1.shape[1]
    N = w2.shape[1]
    out_dtype = x.dtype
    cdt = jnp.dtype(compute_dtype if compute_dtype is not None else x.dtype)
    sub_m = _sublane_pack(cdt)

    Mp0 = _round_up(M, sub_m)
    tm = min(_round_up(tm, sub_m), Mp0)
    # v7x megacore: give the single parallel axis >= 2 tiles when possible.
    if Mp0 <= tm and Mp0 >= 2 * sub_m and Mp0 % (2 * sub_m) == 0:
        tm = Mp0 // 2
    Mp = _round_up(M, tm)
    Kp = _round_up(K, 128)
    Hp = _round_up(H, 128)
    Np = _round_up(N, 128)

    xp = _pad2(x.astype(cdt), Mp, Kp)
    w1p = _pad2(w1.astype(cdt), Kp, Hp)
    b1p = _pad2(b1.reshape(1, H).astype(jnp.float32), 1, Hp)
    w2p = _pad2(w2.astype(cdt), Hp, Np)
    b2p = _pad2(b2.reshape(1, N).astype(jnp.float32), 1, Np)

    grid = (Mp // tm,)
    out = pl.pallas_call(
        _mlp2_kernel,
        out_shape=jax.ShapeDtypeStruct((Mp, Np), out_dtype),
        grid_spec=pltpu.PrefetchScalarGridSpec(
            num_scalar_prefetch=0,
            grid=grid,
            in_specs=[
                pl.BlockSpec((tm, Kp), lambda i: (i, 0)),
                _resident_spec((Kp, Hp), lambda i: (0, 0), single_buffer_weights),
                _resident_spec((1, Hp), lambda i: (0, 0), single_buffer_weights),
                _resident_spec((Hp, Np), lambda i: (0, 0), single_buffer_weights),
                _resident_spec((1, Np), lambda i: (0, 0), single_buffer_weights),
            ],
            out_specs=pl.BlockSpec((tm, Np), lambda i: (i, 0)),
            scratch_shapes=[pltpu.VMEM((tm, Hp), cdt)],
        ),
        compiler_params=_compiler_params(("parallel",)),
    )(xp, w1p, b1p, w2p, b2p)
    if (Mp, Np) != (M, N):
        out = out[:M, :N]
    return out


def _fused_fits_vmem(x, params, *, tm=512, compute_dtype=jnp.bfloat16,
                     single_buffer_weights=True):
    """Per-operand byte estimate of the fused kernel's resident VMEM against a
    generation-aware budget (v7x 64 MiB vs v5e/v6e 128 MiB)."""
    (w1, _), (w2, _) = params
    M, K = x.shape
    H = w1.shape[1]
    N = w2.shape[1]
    cdt = jnp.dtype(compute_dtype if compute_dtype is not None else x.dtype)
    odt = jnp.dtype(x.dtype)
    sub_m = _sublane_pack(cdt)
    tmc = min(_round_up(tm, sub_m), _round_up(M, sub_m))
    Kp, Hp, Np = _round_up(K, 128), _round_up(H, 128), _round_up(N, 128)
    wbuf = 1 if single_buffer_weights else 2
    weights = wbuf * (Kp * Hp + Hp * Np) * cdt.itemsize
    biases = wbuf * (Hp + Np) * 4
    x_tiles = 2 * tmc * Kp * cdt.itemsize        # double-buffered input tile
    o_tiles = 2 * tmc * Np * odt.itemsize        # double-buffered output tile
    h_scratch = tmc * Hp * cdt.itemsize
    total = weights + biases + x_tiles + o_tiles + h_scratch
    return int(total * 1.15) <= _vmem_budget_bytes()   # ~15% headroom


# ----------------------------------------------------------------------------
# parameter init + forward matching the PyTorch module
# ----------------------------------------------------------------------------
def init_mlp_params(key, D_in, D_out, n_layer=1):
    """Mimics PyTorch nn.Linear default init:
    uniform(-1/sqrt(fan_in), 1/sqrt(fan_in)) for weight and bias."""
    params = []
    fan_ins = [D_in] + [D_out] * (n_layer - 1)
    for fan_in in fan_ins:
        key, kw, kb = jax.random.split(key, 3)
        bound = 1.0 / jnp.sqrt(jnp.float32(fan_in))
        w = jax.random.uniform(kw, (fan_in, D_out), jnp.float32, -bound, bound)
        b = jax.random.uniform(kb, (D_out,), jnp.float32, -bound, bound)
        params.append((w, b))
    return params


def mlp_forward(x, params, *, fuse=True, compute_dtype=jnp.bfloat16):
    """Matches MLP.forward:
      n_layer=1: relu(linear(x))
      n_layer=2: relu(linear2(relu(linear1(x))))
    The 2-layer case runs as one fused pallas_call when the resident weights
    fit VMEM; otherwise it falls back to two tiled linear_relu calls.
    """
    if len(params) == 2 and fuse and _fused_fits_vmem(
            x, params, compute_dtype=compute_dtype):
        (w1, b1), (w2, b2) = params
        for single_buf in (True, False):
            try:
                out = mlp2_fused(x, w1, b1, w2, b2,
                                 compute_dtype=compute_dtype,
                                 single_buffer_weights=single_buf)
                jax.block_until_ready(out)
                return out
            except Exception:
                continue      # Buffered(1) unsupported / VMEM OOM -> retry / fall back
    out = x
    for (w, b) in params:
        out = linear_relu(out, w, b, compute_dtype=compute_dtype)
    return out


def mlp_reference(x, params, compute_dtype=None):
    """Pure-JAX reference. compute_dtype=None -> exact f32; bf16 mirrors the
    kernel's operand/hidden quantization with f32 accumulation."""
    out = x
    for (w, b) in params:
        if compute_dtype is not None:
            lhs, rhs = out.astype(compute_dtype), w.astype(compute_dtype)
        else:
            lhs, rhs = out, w
        y = jnp.dot(lhs, rhs, preferred_element_type=jnp.float32) + b
        out = jnp.maximum(y, 0.0).astype(x.dtype)
    return out


# ----------------------------------------------------------------------------
if __name__ == "__main__":
    key = jax.random.PRNGKey(0)
    B, D_in, D_out = 8, 32, 32

    key, kx, kp1, kp2, kx3, kp3 = jax.random.split(key, 6)
    x = jax.random.normal(kx, (B, D_in), jnp.float32)

    # --- n_layer = 1, exact f32 compute path (validates kernel structure) ---
    params1 = init_mlp_params(kp1, D_in, D_out, n_layer=1)
    y1_f32 = mlp_forward(x, params1, compute_dtype=jnp.float32)
    jax.block_until_ready(y1_f32)
    ref1_f32 = mlp_reference(x, params1, compute_dtype=None)
    assert jnp.allclose(y1_f32, ref1_f32, atol=1e-4, rtol=1e-4), "n_layer=1 f32 mismatch"

    # --- n_layer = 1, default bf16-fed MXU path (f32 accumulate) ---
    y1 = mlp_forward(x, params1)
    jax.block_until_ready(y1)
    ref1_bf16 = mlp_reference(x, params1, compute_dtype=jnp.bfloat16)
    assert jnp.allclose(y1, ref1_bf16, atol=2e-2, rtol=2e-2), "n_layer=1 bf16 mismatch"
    assert jnp.allclose(y1, ref1_f32, atol=5e-2, rtol=5e-2), "n_layer=1 bf16 drift"

    # --- n_layer = 2, fused single-kernel path (bf16 default) ---
    params2 = init_mlp_params(kp2, D_in, D_out, n_layer=2)
    y2 = mlp_forward(x, params2)
    jax.block_until_ready(y2)
    ref2_bf16 = mlp_reference(x, params2, compute_dtype=jnp.bfloat16)
    ref2_f32 = mlp_reference(x, params2, compute_dtype=None)
    assert jnp.allclose(y2, ref2_bf16, atol=2e-2, rtol=2e-2), "n_layer=2 fused mismatch"
    assert jnp.allclose(y2, ref2_f32, atol=5e-2, rtol=5e-2), "n_layer=2 fused drift"

    # --- n_layer = 2, forced tiled fallback path (two pallas_calls) ---
    y2b = mlp_forward(x, params2, fuse=False)
    jax.block_until_ready(y2b)
    assert jnp.allclose(y2b, ref2_bf16, atol=2e-2, rtol=2e-2), "n_layer=2 tiled mismatch"

    # --- multi-tile (M, N, K) grid exercising accumulator init/epilogue (f32) ---
    B3, K3, N3 = 32, 320, 256
    x3 = jax.random.normal(kx3, (B3, K3), jnp.float32)
    p3 = init_mlp_params(kp3, K3, N3, n_layer=1)
    y3 = linear_relu(x3, p3[0][0], p3[0][1], tm=8, tn=128, tk=128,
                     compute_dtype=jnp.float32)
    jax.block_until_ready(y3)
    ref3_f32 = mlp_reference(x3, p3, compute_dtype=None)
    assert jnp.allclose(y3, ref3_f32, atol=1e-3, rtol=1e-3), "tiled-grid f32 mismatch"

    # Same shapes, default bf16 + auto tiles (also exercises the 2-tile N split
    # used to engage both TensorCores on v7x).
    y3b = linear_relu(x3, p3[0][0], p3[0][1])
    jax.block_until_ready(y3b)
    ref3_bf16 = mlp_reference(x3, p3, compute_dtype=jnp.bfloat16)
    assert jnp.allclose(y3b, ref3_bf16, atol=2e-2, rtol=2e-2), "tiled-grid bf16 mismatch"

    print("KERNEL_OK")
</pallas_src>

<mosaic_0001>
module attributes {stable_mosaic.version = 11 : i64} {
  func.func @_linear_relu_kernel(%arg0: i32, %arg1: i32, %arg2: i32, %arg3: memref<8x128xf32, #tpu.memory_space<vmem>>, %arg4: memref<128x128xf32, #tpu.memory_space<vmem>>, %arg5: memref<1x128xf32, #tpu.memory_space<vmem>>, %arg6: memref<8x128xf32, #tpu.memory_space<vmem>>, %arg7: memref<8x128xf32, #tpu.memory_space<vmem>>) attributes {dimension_semantics = [#tpu.dimension_semantics<parallel>, #tpu.dimension_semantics<parallel>, #tpu.dimension_semantics<arbitrary>], iteration_bounds = array<i64: 1, 1, 1>, scalar_prefetch = 0 : i64, scratch_operands = 1 : i64, tpu.core_type = #tpu.core_type<tc>, window_params = [{transform_indices = @transform_0, window_bounds = array<i64: 8, 128>}, {transform_indices = @transform_1, window_bounds = array<i64: 128, 128>}, {transform_indices = @transform_2, window_bounds = array<i64: 1, 128>}, {transform_indices = @transform_3, window_bounds = array<i64: 8, 128>}]} {
    %c0 = arith.constant 0 : index
    %c0_0 = arith.constant 0 : index
    %0 = vector.load %arg3[%c0, %c0_0] : memref<8x128xf32, #tpu.memory_space<vmem>>, vector<8x128xf32>
    %c0_1 = arith.constant 0 : index
    %c0_2 = arith.constant 0 : index
    %1 = vector.load %arg4[%c0_1, %c0_2] : memref<128x128xf32, #tpu.memory_space<vmem>>, vector<128x128xf32>
    %cst = arith.constant dense<0.000000e+00> : vector<8x128xf32>
    %2 = tpu.matmul %0, %1, %cst {dimension_numbers = #tpu.dot_dimension_numbers<[1], [0], [0], [1], [0, 0, 1, 1], [], []>} : vector<8x128xf32>, vector<128x128xf32>, vector<8x128xf32> -> vector<8x128xf32>
    %c0_i32 = arith.constant 0 : i32
    %3 = arith.cmpi eq, %arg2, %c0_i32 : i32
    %4 = arith.extui %3 : i1 to i32
    %c0_i32_3 = arith.constant 0 : i32
    %5 = arith.cmpi ne, %4, %c0_i32_3 : i32
    scf.if %5 {
      %c0_8 = arith.constant 0 : index
      %c0_9 = arith.constant 0 : index
      %12 = vector.load %arg7[%c0_8, %c0_9] : memref<8x128xf32, #tpu.memory_space<vmem>>, vector<8x128xf32>
      tpu.vector_store %arg7[%c0_8, %c0_9], %2 {strides = array<i32>} : memref<8x128xf32, #tpu.memory_space<vmem>>, vector<8x128xf32>,
    } else {
    }
    %c0_i32_4 = arith.constant 0 : i32
    %6 = arith.cmpi sgt, %arg2, %c0_i32_4 : i32
    %7 = arith.extui %6 : i1 to i32
    %c0_i32_5 = arith.constant 0 : i32
    %8 = arith.cmpi ne, %7, %c0_i32_5 : i32
    scf.if %8 {
      %c0_8 = arith.constant 0 : index
      %c0_9 = arith.constant 0 : index
      %12 = vector.load %arg7[%c0_8, %c0_9] : memref<8x128xf32, #tpu.memory_space<vmem>>, vector<8x128xf32>
      %13 = arith.addf %12, %2 : vector<8x128xf32>
      %c0_10 = arith.constant 0 : index
      %c0_11 = arith.constant 0 : index
      %14 = vector.load %arg7[%c0_10, %c0_11] : memref<8x128xf32, #tpu.memory_space<vmem>>, vector<8x128xf32>
      tpu.vector_store %arg7[%c0_10, %c0_11], %13 {strides = array<i32>} : memref<8x128xf32, #tpu.memory_space<vmem>>, vector<8x128xf32>,
    } else {
    }
    %c0_i32_6 = arith.constant 0 : i32
    %9 = arith.cmpi eq, %arg2, %c0_i32_6 : i32
    %10 = arith.extui %9 : i1 to i32
    %c0_i32_7 = arith.constant 0 : i32
    %11 = arith.cmpi ne, %10, %c0_i32_7 : i32
    scf.if %11 {
      %c0_8 = arith.constant 0 : index
      %c0_9 = arith.constant 0 : index
      %12 = vector.load %arg7[%c0_8, %c0_9] : memref<8x128xf32, #tpu.memory_space<vmem>>, vector<8x128xf32>
      %c0_10 = arith.constant 0 : index
      %c0_11 = arith.constant 0 : index
      %13 = vector.load %arg5[%c0_10, %c0_11] : memref<1x128xf32, #tpu.memory_space<vmem>>, vector<1x128xf32>
      %14 = vector.broadcast %13 : vector<1x128xf32> to vector<8x128xf32>
      %15 = arith.addf %12, %14 : vector<8x128xf32>
      %cst_12 = arith.constant 0.000000e+00 : f32
      %16 = vector.broadcast %cst_12 : f32 to vector<8x128xf32>
      %17 = arith.maximumf %15, %16 : vector<8x128xf32>
      %c0_13 = arith.constant 0 : index
      %c0_14 = arith.constant 0 : index
      %18 = vector.load %arg6[%c0_13, %c0_14] : memref<8x128xf32, #tpu.memory_space<vmem>>, vector<8x128xf32>
      tpu.vector_store %arg6[%c0_13, %c0_14], %17 {strides = array<i32>} : memref<8x128xf32, #tpu.memory_space<vmem>>, vector<8x128xf32>,
    } else {
    }
    return
  }
  func.func @transform_0(%arg0: i32, %arg1: i32, %arg2: i32) -> (i32, i32) {
    %c0_i32 = arith.constant 0 : i32
    return %arg0, %arg2 : i32, i32
  }
  func.func @transform_1(%arg0: i32, %arg1: i32, %arg2: i32) -> (i32, i32) {
    %c0_i32 = arith.constant 0 : i32
    return %arg2, %arg1 : i32, i32
  }
  func.func @transform_2(%arg0: i32, %arg1: i32, %arg2: i32) -> (i32, i32) {
    %c0_i32 = arith.constant 0 : i32
    %c0_i32_0 = arith.constant 0 : i32
    return %c0_i32, %arg1 : i32, i32
  }
  func.func @transform_3(%arg0: i32, %arg1: i32, %arg2: i32) -> (i32, i32) {
    %c0_i32 = arith.constant 0 : i32
    return %arg0, %arg1 : i32, i32
  }
}

</mosaic_0001>

<bundles_post_ra>
// kernel: tpu_custom_call.1
= control target key start
LH: loop header
LB: loop body
LE: loop exit
PB: predicated region body
PF: predicated region fallthrough
CT: control target
= control target key end

     0   :  { %8 = vsyncpa [#allocation4], 0  ;;  %s401_s0 = inlined_call_operand.hbm [shape: f32[8,128], index: 0, kind: input, shape index: {}]   ;;  %s402_s1 = inlined_call_operand.hbm [shape: f32[128,128], index: 1, kind: input, shape index: {}]   ;;  %s403_s2 = inlined_call_operand.vmem [shape: f32[1,128], index: 2, kind: input, shape index: {}]   ;;  %s404_s3 = inlined_call_operand.hbm [shape: f32[8,128], index: 3, kind: output, shape index: {}]  }
   0x1   :  { %9 = vsyncpa [#allocation7], 0 }
   0x2   :  { %10 = vsyncpa [#allocation5], 0  ;;  %s327_s12 = smov [#allocation3]   ;;  %s328_s14 = smov [#allocation6]  }
   0x3   :  { %s17_s13 = sshll.u32 %s327_s12, 4  ;;  %s26_s15 = sshll.u32 %s328_s14, 4  ;;  %s18_s13 = int_to_ptr.vmem [resolvable:$true] %s17_s13  ;;  %s355_s15 = int_to_ptr.vmem [resolvable:$true] %s26_s15 }
   0x4   :  { %s255_s18 = scalar_lea.hbm %s401_s0, 128 }
   0x5   :  { %p256_p0 = scmp.ne.s32.totalorder %s401_s0, %s255_s18  ;;  %p259_p1 = scmp.lt.u32.totalorder %s255_s18, %s401_s0 }
   0x7   :  { %p261_p2 = pnand %p259_p1, %p256_p0 }
   0x9   :  { %264 = shalt.err (!%p261_p2)
}
   0xa   :  { %s265_s23 = scalar_lea.vmem %s18_s13, 128  ;;  %p270_p4 = scmp.lt.s32.totalorder %s18_s13, %s18_s13 }
   0xb   :  { %p266_p3 = scmp.ne.s32.totalorder %s18_s13, %s265_s23  ;;  %p271_p5 = scmp.lt.s32.totalorder %s265_s23, %s265_s23 }
   0xd   :  { %p272_p6 = por %p271_p5, %p270_p4 }
   0xf   :  { %p273_p7 = pnand %p272_p6, %p266_p3 }
  0x11   :  { %276 = shalt.err (!%p273_p7)
}
  0x12   :  { %20 = dma.hbm_to_vmem [thread:$0]  %s401_s0, 128, %s18_s13, [#allocation4]  }
  0x13   :  { %s277_s28 = scalar_lea.hbm %s402_s1, 2048 }
  0x14   :  { %p278_p8 = scmp.ne.s32.totalorder %s402_s1, %s277_s28  ;;  %p281_p9 = scmp.lt.u32.totalorder %s277_s28, %s402_s1 }
  0x16   :  { %p283_p10 = pnand %p281_p9, %p278_p8 }
  0x18   :  { %286 = shalt.err (!%p283_p10)
}
  0x19   :  { %s287_s6 = scalar_lea.vmem %s355_s15, 2048  ;;  %p292_p12 = scmp.lt.s32.totalorder %s355_s15, %s355_s15 }
  0x1a   :  { %p288_p11 = scmp.ne.s32.totalorder %s355_s15, %s287_s6  ;;  %p293_p13 = scmp.lt.s32.totalorder %s287_s6, %s287_s6 }
  0x1c   :  { %p294_p0 = por %p293_p13, %p292_p12 }
  0x1e   :  { %p295_p1 = pnand %p294_p0, %p288_p11 }
  0x20   :  { %298 = shalt.err (!%p295_p1)
}
  0x21   :  { %s329_s0 = smov 128   ;;  %s330_s7 = smov 8  }
  0x22   :  { %32 = dma.hbm_to_vmem [thread:$0]  %s402_s1, 2048, %s355_s15, [#allocation7], %s329_s0, %s329_s0, %s330_s7  }
  0x23   :  { %321 = dma.done.wait [#allocation4], 128  }
  0x24   :  { %322 = vsyncadd [#allocation4], 4294967168 }
  0x25   :  { %323 = dma.done.wait [#allocation7], 2048  }
  0x26   :  { %324 = vsyncadd [#allocation7], 4294965248  ;;  %v331_v0 = vmov 0.0|0.0   ;;  %vm332_vm0 = vmmov 0   ;;  %v333_v1 = vmov 0.0   ;;  %v42_v2 = vld [vmem:[#allocation6] sm:$0xff] }
  0x27   :  { %223 = vmatprep.subr.bf16.mxu0 %v331_v0  ;;  %220 = vmatprep.mubr.msk.f32.mxu0 %vm332_vm0, %v333_v1  ;;  %v43_v3 = vld [vmem:[#allocation6 + $0x8] sm:$0xff]  ;;  %v44_v4 = vld [vmem:[#allocation6 + $0x10] sm:$0xff]  ;;  %v45_v6 = vld [vmem:[#allocation6 + $0x18] sm:$0xff]  ;;  %s334_s11 = smov [#allocation8]  }
  0x28   :  { %v224_v5 = vpack.c.bf16 %v43_v3, %v42_v2  ;;  %v227_v7 = vpack.c.bf16 %v45_v6, %v44_v4  ;;  %v46_v8 = vld [vmem:[#allocation6 + $0x20] sm:$0xff]  ;;  %v47_v9 = vld [vmem:[#allocation6 + $0x28] sm:$0xff]  ;;  %v48_v11 = vld [vmem:[#allocation6 + $0x30] sm:$0xff]  ;;  %s160_s12 = sshll.u32 %s334_s11, 4  ;;  %s161_s12 = int_to_ptr.vmem [resolvable:$true] %s160_s12 }
  0x29   :  { %v230_v10 = vpack.c.bf16 %v47_v9, %v46_v8  ;;  %v49_v12 = vld [vmem:[#allocation6 + $0x38] sm:$0xff]  ;;  %v50_v14 = vld [vmem:[#allocation6 + $0x40] sm:$0xff]  ;;  %v51_v15 = vld [vmem:[#allocation6 + $0x48] sm:$0xff]  ;;  %s299_s13 = scalar_lea.vmem %s161_s12, 128  ;;  %p304_p3 = scmp.lt.s32.totalorder %s161_s12, %s161_s12 }
  0x2a   :  { %225 = vmatpush3.bf16.msra.mxu0 %v224_v5  ;;  %v233_v13 = vpack.c.bf16 %v49_v12, %v48_v11  ;;  %v236_v16 = vpack.c.bf16 %v51_v15, %v50_v14  ;;  %v52_v17 = vld [vmem:[#allocation6 + $0x50] sm:$0xff]  ;;  %v53_v18 = vld [vmem:[#allocation6 + $0x58] sm:$0xff]  ;;  %v54_v20 = vld [vmem:[#allocation6 + $0x60] sm:$0xff]  ;;  %p300_p2 = scmp.ne.s32.totalorder %s161_s12, %s299_s13  ;;  %p305_p4 = scmp.lt.s32.totalorder %s299_s13, %s299_s13 }
  0x2b   :  { %226 = vmatprep.subr.bf16.mxu0 %v331_v0  ;;  %v239_v19 = vpack.c.bf16 %v53_v18, %v52_v17  ;;  %v55_v21 = vld [vmem:[#allocation6 + $0x68] sm:$0xff]  ;;  %v56_v23 = vld [vmem:[#allocation6 + $0x70] sm:$0xff]  ;;  %v57_v24 = vld [vmem:[#allocation6 + $0x78] sm:$0xff] }
  0x2c   :  { %v242_v22 = vpack.c.bf16 %v55_v21, %v54_v20  ;;  %v245_v25 = vpack.c.bf16 %v57_v24, %v56_v23  ;;  %v41_v26 = vld [vmem:[#allocation3] sm:$0xff]  ;;  %p306_p5 = por %p305_p4, %p304_p3 }
  0x2d   :  { %v170_v27 = vld [vmem:[%s403_s2] ss:$0 sm:$0xff] }
  0x2e   :  { %228 = vmatpush3.bf16.msra.mxu0 %v227_v7  ;;  %p307_p6 = pnand %p306_p5, %p300_p2 }
  0x2f   :  { %229 = vmatprep.subr.bf16.mxu0 %v331_v0 }
  0x32   :  { %231 = vmatpush3.bf16.msra.mxu0 %v230_v10 }
  0x33   :  { %232 = vmatprep.subr.bf16.mxu0 %v331_v0 }
  0x36   :  { %234 = vmatpush3.bf16.msra.mxu0 %v233_v13 }
  0x37   :  { %235 = vmatprep.subr.bf16.mxu0 %v331_v0 }
  0x3a   :  { %237 = vmatpush3.bf16.msra.mxu0 %v236_v16 }
  0x3b   :  { %238 = vmatprep.subr.bf16.mxu0 %v331_v0 }
  0x3e   :  { %240 = vmatpush3.bf16.msra.mxu0 %v239_v19 }
  0x3f   :  { %241 = vmatprep.subr.bf16.mxu0 %v331_v0 }
  0x42   :  { %243 = vmatpush3.bf16.msra.mxu0 %v242_v22 }
  0x43   :  { %244 = vmatprep.subr.bf16.mxu0 %v331_v0 }
  0x46   :  { %246 = vmatpush3.bf16.msra.mxu0 %v245_v25 }
  0x49   :  { %221 = vmatmul.mubr.f32.vlgmr.msra.gmra.mrb[0].mxu0 %v41_v26 }
 0x11c   :  { %v124_v28 = vpop.f32.mrb[0].mxu0 }
 0x11d   :  { %v151_v29 = vadd.f32 %v170_v27, %v124_v28  ;;  %v222_v30 = vpop.f32.mrb[1].mxu0 }
 0x11f   :  { %v152_v31 = vmax.f32 %v151_v29, 0.0 }
 0x121   :  { %153 = vst [vmem:[#allocation8] sm:$0xff] %v152_v31 }
 0x122   :  { %310 = shalt.err (!%p307_p6)
}
 0x123   :  { %s311_s16 = scalar_lea.hbm %s404_s3, 128 }
 0x124   :  { %p312_p7 = scmp.ne.s32.totalorder %s404_s3, %s311_s16  ;;  %p315_p8 = scmp.lt.u32.totalorder %s311_s16, %s404_s3 }
 0x126   :  { %p317_p9 = pnand %p315_p8, %p312_p7 }
 0x128   :  { %320 = shalt.err (!%p317_p9)
}
 0x129   :  { %163 = dma.vmem_to_hbm [thread:$0]  %s161_s12, 128, %s404_s3, [#allocation5]  }
 0x12a   :  { %325 = dma.done.wait [#allocation5], 128  }
 0x12b   :  { %326 = vsyncadd [#allocation5], 4294967168 }
 0x12c   :  { %167 = vsyncpa [#allocation4], 1 }
 0x12d   :  { %168 = vsyncpa [#allocation7], 1 }
 0x12e   :  { %169 = vsyncpa [#allocation5], 1 }

</bundles_post_ra>
